<compile_context>
chip_gen: v5e
topology: v5e:2x2
jax: 0.10.0
libtpu: 0.0.40
codegen_flags: <defaults>
</compile_context>

<pallas_src>
import functools
import math

import jax
import jax.numpy as jnp
from jax import lax
from jax.experimental import pallas as pl
from jax.experimental.pallas import tpu as pltpu


def _round_up(x, m):
    return (x + m - 1) // m * m


# ---------------------------------------------------------------------------
# Prologue: one-shot L2 normalization + positives (hoisted out of the grid).
# ---------------------------------------------------------------------------
def _normalize_kernel(x_ref, p_ref, xn_ref, pos_ref, *, operand_dtype):
    """x_ref/p_ref: (tm, D) rows of reps and their positive partners.

    xn_ref : (tm, D) operand_dtype -- L2-normalized rows (MXU operands)
    pos_ref: (tm, 1) f32           -- <z_r, z_partner(r)> in f32
    """
    def l2norm(v):
        # F.normalize(x, dim=1, p=2): x / max(||x||, 1e-12)
        #   == x * rsqrt(max(||x||^2, 1e-24))
        ssq = jnp.sum(v * v, axis=1, keepdims=True)
        return v * lax.rsqrt(jnp.maximum(ssq, 1e-24))

    xn = l2norm(x_ref[...].astype(jnp.float32))
    pn = l2norm(p_ref[...].astype(jnp.float32))
    pos_ref[...] = jnp.sum(xn * pn, axis=1, keepdims=True)
    xn_ref[...] = xn.astype(operand_dtype)


# ---------------------------------------------------------------------------
# Main kernel: sim rowsums (MXU) -> per-row NT-Xent loss.
# ---------------------------------------------------------------------------
def _ntxent_kernel(q_ref, k_ref, pos_ref, out_ref, denom_ref, *,
                   inv_temp, pad_cols):
    """One (row-tile, col-tile) step.

    q_ref    : (tm, D)  operand dtype -- normalized query rows
    k_ref    : (tn, D)  operand dtype -- normalized key rows (sim columns)
    pos_ref  : (tm, 1)  f32           -- positives per row
    out_ref  : (tm, 1)  f32           -- per-row loss (written on last col step)
    denom_ref: (tm, 1)  f32 scratch   -- running rowsum(exp(sim / T))
    """
    j = pl.program_id(1)

    @pl.when(j == 0)
    def _init():
        denom_ref[...] = jnp.zeros_like(denom_ref)

    # sim[r, c] = <q_r, k_c>: contract the lane (feature) axis of both
    # operands (flash-attention style, no materialized transpose); bf16
    # operands feed the MXU, accumulation in f32.
    sim = lax.dot_general(q_ref[...], k_ref[...], (((1,), (1,)), ((), ())),
                          preferred_element_type=jnp.float32)
    denom_ref[...] += jnp.sum(jnp.exp(sim * inv_temp), axis=1, keepdims=True)

    @pl.when(j == pl.num_programs(1) - 1)
    def _finalize():
        # Remove the self-similarity term exactly as the MXU computed it
        # (same bf16 operands, f32 accumulation), and remove the 2*pad
        # zero-padded key columns which each contributed exp(0) == 1.
        qf = q_ref[...].astype(jnp.float32)
        self_sim = jnp.sum(qf * qf, axis=1, keepdims=True)
        denom = denom_ref[...] - jnp.exp(self_sim * inv_temp) - pad_cols
        # -log(exp(pos/T) / denom) == -pos/T + log(denom)
        out_ref[...] = jnp.log(denom) - pos_ref[...] * inv_temp


# ---------------------------------------------------------------------------
# Wrapper
# ---------------------------------------------------------------------------
def contrastive_loss(emb_i, emb_j, temperature=0.5, *, row_tile=None,
                     col_tile=None, operand_dtype=jnp.bfloat16,
                     vmem_block_budget=24 * 1024 * 1024):
    """NT-Xent contrastive loss (SimCLR), Pallas TPU implementation.

    emb_i, emb_j: (batch, dim); corresponding rows are positive pairs.
    Returns a scalar float32 loss matching the PyTorch ContrastiveLoss.
    """
    assert emb_i.shape == emb_j.shape and emb_i.ndim == 2
    n, d = emb_i.shape

    # ---- row tile & padding: each half padded so 2*n_pad is 256-aligned ----
    if row_tile is None:
        tm = 256 if n > 128 else 128
    else:
        tm = _round_up(row_tile, 8)
    align = tm * 128 // math.gcd(tm, 128)          # lcm(tm, 128)
    n_pad = _round_up(n, align)
    two_n = 2 * n_pad
    pad = n_pad - n

    # ---- column tile: keep the full key matrix VMEM-resident when it fits --
    item = jnp.dtype(operand_dtype).itemsize

    def vmem_est(tn):
        return (2 * tn * d * item          # double-buffered key block
                + 2 * tm * d * item        # double-buffered query block
                + 3 * tm * tn * 4          # sim / exp f32 temporaries (slack)
                + 8 * tm * 4)              # pos, out, denom scratch

    if col_tile is not None:
        tn = min(_round_up(col_tile, 128), two_n)
        while two_n % tn:
            tn -= 128
    else:
        # lane-dense candidates: multiples of 128 that divide 2N, descending
        candidates = [c for c in range(two_n, 127, -128) if two_n % c == 0]
        tn = next((c for c in candidates if vmem_est(c) <= vmem_block_budget),
                  candidates[-1])

    # ---- reps = [emb_i ; emb_j], zero-padded per half ------------------------
    if pad:
        zeros = jnp.zeros((pad, d), dtype=emb_i.dtype)
        zi = jnp.concatenate([emb_i, zeros], axis=0)
        zj = jnp.concatenate([emb_j, zeros], axis=0)
    else:
        zi, zj = emb_i, emb_j
    reps = jnp.concatenate([zi, zj], axis=0)                 # (2*n_pad, d)

    n_row_blocks = two_n // tm
    half_blocks = n_pad // tm

    # ---- prologue: one-shot normalize + positives ---------------------------
    reps_n, positives = pl.pallas_call(
        functools.partial(_normalize_kernel, operand_dtype=operand_dtype),
        out_shape=(jax.ShapeDtypeStruct((two_n, d), operand_dtype),
                   jax.ShapeDtypeStruct((two_n, 1), jnp.float32)),
        grid_spec=pltpu.PrefetchScalarGridSpec(
            num_scalar_prefetch=0,
            grid=(n_row_blocks,),
            in_specs=[
                pl.BlockSpec((tm, d), lambda i: (i, 0)),
                pl.BlockSpec((tm, d),
                             lambda i: ((i + half_blocks) % n_row_blocks, 0)),
            ],
            out_specs=[
                pl.BlockSpec((tm, d), lambda i: (i, 0)),
                pl.BlockSpec((tm, 1), lambda i: (i, 0)),
            ],
        ),
        compiler_params=pltpu.CompilerParams(
            dimension_semantics=("parallel",)),
    )(reps, reps)

    # ---- main kernel ---------------------------------------------------------
    inv_temp = 1.0 / float(temperature)        # baked in at trace time
    kernel = functools.partial(_ntxent_kernel, inv_temp=inv_temp,
                               pad_cols=float(2 * pad))

    loss_rows = pl.pallas_call(
        kernel,
        out_shape=jax.ShapeDtypeStruct((two_n, 1), jnp.float32),
        grid_spec=pltpu.PrefetchScalarGridSpec(
            num_scalar_prefetch=0,
            grid=(n_row_blocks, two_n // tn),
            in_specs=[
                pl.BlockSpec((tm, d), lambda i, j: (i, 0)),   # query rows
                pl.BlockSpec((tn, d), lambda i, j: (j, 0)),   # key rows
                pl.BlockSpec((tm, 1), lambda i, j: (i, 0)),   # positives
            ],
            out_specs=pl.BlockSpec((tm, 1), lambda i, j: (i, 0)),
            scratch_shapes=[pltpu.VMEM((tm, 1), jnp.float32)],
        ),
        compiler_params=pltpu.CompilerParams(
            dimension_semantics=("parallel", "arbitrary"),
            vmem_limit_bytes=48 * 1024 * 1024),
    )(reps_n, reps_n, positives)

    # Final tiny reduction (2N values) in the wrapper; padded rows dropped.
    loss_rows = loss_rows[:, 0]
    valid = jnp.concatenate([loss_rows[:n], loss_rows[n_pad:n_pad + n]])
    return jnp.sum(valid) / jnp.float32(2 * n)


# ---------------------------------------------------------------------------
# Pure-JAX reference mirroring the PyTorch module (sanity check only).
# ---------------------------------------------------------------------------
def _reference_loss(emb_i, emb_j, temperature=0.5):
    n = emb_i.shape[0]

    def norm(x):
        return x / jnp.maximum(jnp.linalg.norm(x, axis=1, keepdims=True), 1e-12)

    reps = jnp.concatenate([norm(emb_i), norm(emb_j)], axis=0)
    sim = jnp.matmul(reps, reps.T, precision=lax.Precision.HIGHEST)
    positives = jnp.concatenate([jnp.diagonal(sim, offset=n),
                                 jnp.diagonal(sim, offset=-n)], axis=0)
    neg_mask = 1.0 - jnp.eye(2 * n, dtype=jnp.float32)
    denominator = jnp.sum(neg_mask * jnp.exp(sim / temperature), axis=1)
    loss_partial = -jnp.log(jnp.exp(positives / temperature) / denominator)
    return jnp.sum(loss_partial) / (2 * n)


if __name__ == "__main__":
    key = jax.random.PRNGKey(0)
    k1, k2, k3, k4 = jax.random.split(key, 4)

    # Case 1: default bf16 MXU path, full key matrix resident (single column
    # step), exercises zero-padding corrections (batch not a tile multiple).
    b1, d1, t1 = 8, 32, 0.5
    emb_i = jax.random.normal(k1, (b1, d1), dtype=jnp.float32)
    emb_j = jax.random.normal(k2, (b1, d1), dtype=jnp.float32)
    loss = jax.block_until_ready(contrastive_loss(emb_i, emb_j, t1))
    ref = _reference_loss(emb_i, emb_j, t1)
    assert jnp.allclose(loss, ref, rtol=2e-2, atol=2e-2), (loss, ref)

    # Case 2: f32 operands (exact parity with the reference) and a forced
    # multi-column-tile reduction (accumulator init/finalize path).
    b2, d2, t2 = 6, 64, 0.7
    emb_i2 = jax.random.normal(k3, (b2, d2), dtype=jnp.float32)
    emb_j2 = jax.random.normal(k4, (b2, d2), dtype=jnp.float32)
    loss2 = jax.block_until_ready(
        contrastive_loss(emb_i2, emb_j2, t2, operand_dtype=jnp.float32,
                         row_tile=128, col_tile=128))
    ref2 = _reference_loss(emb_i2, emb_j2, t2)
    assert jnp.allclose(loss2, ref2, rtol=1e-4, atol=1e-4), (loss2, ref2)

    print("KERNEL_OK")
</pallas_src>

<mosaic_0001>
module attributes {stable_mosaic.version = 11 : i64} {
  func.func @_normalize_kernel(%arg0: i32, %arg1: memref<128x32xf32, #tpu.memory_space<vmem>>, %arg2: memref<128x32xf32, #tpu.memory_space<vmem>>, %arg3: memref<128x32xbf16, #tpu.memory_space<vmem>>, %arg4: memref<128x1xf32, #tpu.memory_space<vmem>>) attributes {dimension_semantics = [#tpu.dimension_semantics<parallel>], iteration_bounds = array<i64: 2>, scalar_prefetch = 0 : i64, scratch_operands = 0 : i64, tpu.core_type = #tpu.core_type<tc>, window_params = [{transform_indices = @transform_0, window_bounds = array<i64: 128, 32>}, {transform_indices = @transform_1, window_bounds = array<i64: 128, 32>}, {transform_indices = @transform_2, window_bounds = array<i64: 128, 32>}, {transform_indices = @transform_3, window_bounds = array<i64: 128, 1>}]} {
    %c0 = arith.constant 0 : index
    %c0_0 = arith.constant 0 : index
    %0 = vector.load %arg1[%c0, %c0_0] : memref<128x32xf32, #tpu.memory_space<vmem>>, vector<128x32xf32>
    %1 = arith.mulf %0, %0 : vector<128x32xf32>
    %cst = arith.constant dense<0.000000e+00> : vector<128xf32>
    %2 = vector.multi_reduction <add>, %1, %cst [1] : vector<128x32xf32> to vector<128xf32>
    %3 = vector.shape_cast %2 : vector<128xf32> to vector<128x1xf32>
    %cst_1 = arith.constant 1.000000e-24 : f32
    %4 = vector.broadcast %cst_1 : f32 to vector<128x1xf32>
    %5 = arith.maximumf %3, %4 : vector<128x1xf32>
    %6 = math.rsqrt %5 : vector<128x1xf32>
    %7 = vector.broadcast %6 : vector<128x1xf32> to vector<128x32xf32>
    %8 = arith.mulf %0, %7 : vector<128x32xf32>
    %c0_2 = arith.constant 0 : index
    %c0_3 = arith.constant 0 : index
    %9 = vector.load %arg2[%c0_2, %c0_3] : memref<128x32xf32, #tpu.memory_space<vmem>>, vector<128x32xf32>
    %10 = arith.mulf %9, %9 : vector<128x32xf32>
    %cst_4 = arith.constant dense<0.000000e+00> : vector<128xf32>
    %11 = vector.multi_reduction <add>, %10, %cst_4 [1] : vector<128x32xf32> to vector<128xf32>
    %12 = vector.shape_cast %11 : vector<128xf32> to vector<128x1xf32>
    %cst_5 = arith.constant 1.000000e-24 : f32
    %13 = vector.broadcast %cst_5 : f32 to vector<128x1xf32>
    %14 = arith.maximumf %12, %13 : vector<128x1xf32>
    %15 = math.rsqrt %14 : vector<128x1xf32>
    %16 = vector.broadcast %15 : vector<128x1xf32> to vector<128x32xf32>
    %17 = arith.mulf %9, %16 : vector<128x32xf32>
    %18 = arith.mulf %8, %17 : vector<128x32xf32>
    %cst_6 = arith.constant dense<0.000000e+00> : vector<128xf32>
    %19 = vector.multi_reduction <add>, %18, %cst_6 [1] : vector<128x32xf32> to vector<128xf32>
    %20 = vector.shape_cast %19 : vector<128xf32> to vector<128x1xf32>
    %c0_7 = arith.constant 0 : index
    %c0_8 = arith.constant 0 : index
    %21 = vector.load %arg4[%c0_7, %c0_8] : memref<128x1xf32, #tpu.memory_space<vmem>>, vector<128x1xf32>
    tpu.vector_store %arg4[%c0_7, %c0_8], %20 {strides = array<i32>} : memref<128x1xf32, #tpu.memory_space<vmem>>, vector<128x1xf32>,
    %22 = arith.truncf %8 : vector<128x32xf32> to vector<128x32xbf16>
    %c0_9 = arith.constant 0 : index
    %c0_10 = arith.constant 0 : index
    %23 = vector.load %arg3[%c0_9, %c0_10] : memref<128x32xbf16, #tpu.memory_space<vmem>>, vector<128x32xbf16>
    tpu.vector_store %arg3[%c0_9, %c0_10], %22 {strides = array<i32>} : memref<128x32xbf16, #tpu.memory_space<vmem>>, vector<128x32xbf16>,
    return
  }
  func.func @transform_0(%arg0: i32) -> (i32, i32) {
    %c0_i32 = arith.constant 0 : i32
    %c0_i32_0 = arith.constant 0 : i32
    return %arg0, %c0_i32 : i32, i32
  }
  func.func @transform_1(%arg0: i32) -> (i32, i32) {
    %c1_i32 = arith.constant 1 : i32
    %0 = arith.addi %arg0, %c1_i32 : i32
    %c2_i32 = arith.constant 2 : i32
    %c0_i32 = arith.constant 0 : i32
    %1 = arith.cmpi eq, %c2_i32, %c0_i32 : i32
    %c1_i32_0 = arith.constant 1 : i32
    %2 = arith.select %1, %c1_i32_0, %c2_i32 : i32
    %3 = arith.remsi %0, %2 : i32
    %c0_i32_1 = arith.constant 0 : i32
    %4 = arith.cmpi ne, %3, %c0_i32_1 : i32
    %c0_i32_2 = arith.constant 0 : i32
    %5 = arith.cmpi slt, %3, %c0_i32_2 : i32
    %c0_i32_3 = arith.constant 0 : i32
    %6 = arith.cmpi slt, %2, %c0_i32_3 : i32
    %7 = arith.xori %5, %6 : i1
    %8 = arith.andi %7, %4 : i1
    %9 = arith.addi %3, %2 : i32
    %10 = arith.select %8, %9, %3 : i32
    %c0_i32_4 = arith.constant 0 : i32
    %c0_i32_5 = arith.constant 0 : i32
    return %10, %c0_i32_4 : i32, i32
  }
  func.func @transform_2(%arg0: i32) -> (i32, i32) {
    %c0_i32 = arith.constant 0 : i32
    %c0_i32_0 = arith.constant 0 : i32
    return %arg0, %c0_i32 : i32, i32
  }
  func.func @transform_3(%arg0: i32) -> (i32, i32) {
    %c0_i32 = arith.constant 0 : i32
    %c0_i32_0 = arith.constant 0 : i32
    return %arg0, %c0_i32 : i32, i32
  }
}

</mosaic_0001>

<bundles_post_ra>
// kernel: tpu_custom_call.1
= control target key start
LH: loop header
LB: loop body
LE: loop exit
PB: predicated region body
PF: predicated region fallthrough
CT: control target
= control target key end

     0   :  { %s1196_s12 = smov 0   ;;  %s2263_s0 = inlined_call_operand.vmem [shape: f32[256,32], index: 0, kind: input, shape index: {}]   ;;  %s2264_s1 = inlined_call_operand.vmem [shape: f32[256,32], index: 1, kind: input, shape index: {}]   ;;  %s2265_s2 = inlined_call_operand.vmem [shape: bf16[256,32], index: 2, kind: output, shape index: {0}]   ;;  %s2266_s3 = inlined_call_operand.vmem [shape: f32[256,1], index: 3, kind: output, shape index: {1}]  }
   0x1 LB: > { %s1062_s13 = sadd.s32 4294967295, %s1174_s12   ;;  %p1072_p0 = scmp.ge.s32.totalorder %s1174_s12, 1  ;;  %s1174_s12 = sphi %s1196_s12, %s14_s12  }
   0x2   : > { %p204_p1 = scmp.lt.s32.totalorder %s1174_s12, 3 }
   0x4   : > { %p205_p2 = pnand %p1072_p0, %p204_p1 }
   0x6   : > { %208 = sbr.rel (%p205_p2) target bundleno = 375 (0x177), region = 28 }
   0xb   : > { %s1073_s14 = sshll.u32 %s1062_s13, 4  ;;  %s1204_s15 = sadd.s32 1, %s1062_s13  ;;  %vm333_vm0 = vcmask 261120   ;;  %vm2275_vm4 = vcmask 257024  }
   0xc   : > { %p252_p3 = scmp.lt.s32.totalorder %s1073_s14, 31  ;;  %s259_s16 = ssub.s32 0, %s1204_s15 }
   0xd   : > { %s1075_s17 = smin.u32 %s259_s16, %s1204_s15  ;;  %p258_p4 = scmp.lt.s32.totalorder %s1204_s15, 0 }
   0xe   : > { %s2372_s14 = smov (!%p252_p3, %s1073_s14), 31  ;;  %s261_s22 = sand.u32 1, %s1075_s17  }
   0xf   : > { %s1074_s18 = sshll.u32 %s2372_s14, 3  ;;  %s262_s23 = ssub.s32 0, %s261_s22 }
  0x10   : > { %s1216_s21 = scalar_lea.vmem %s2263_s0, %s1074_s18  ;;  %s2374_s23 = smov (!%p258_p4, %s262_s23), %s261_s22 }
  0x11   : > { %v1219_v0 = vld [vmem:[%s1216_s21 + $0x20] sm:$0xff]  ;;  %v1222_v1 = vld [vmem:[%s1216_s21 + $0x10] sm:$0xff]  ;;  %v1235_v6 = vld [vmem:[%s1216_s21 + $0x28] sm:$0xff]  ;;  %p1077_p5 = scmp.lt.s32.totalorder %s2374_s23, 0  ;;  %s268_s24 = sadd.s32 2, %s2374_s23 }
  0x12   : > { %v1225_v2 = vld [vmem:[%s1216_s21] sm:$0xff]  ;;  %v321_v3 = vmul.f32 %v1219_v0, %v1219_v0  ;;  %v319_v4 = vmul.f32 %v1222_v1, %v1222_v1  ;;  %v1238_v7 = vld [vmem:[%s1216_s21 + $0x18] sm:$0xff]  ;;  %v1244_v11 = vld [vmem:[%s1216_s21 + $0x8] sm:$0xff]  ;;  %v322_v12 = vmul.f32 %v1235_v6, %v1235_v6  ;;  %s1081_s30 = sshll.u32 %s2372_s14, 2  ;;  %s2226_s9 = scalar_lea.vmem %s2266_s3, %s1074_s18 }
  0x13   : > { %v317_v5 = vmul.f32 %v1225_v2, %v1225_v2  ;;  %v320_v13 = vmul.f32 %v1238_v7, %v1238_v7  ;;  %v318_v14 = vmul.f32 %v1244_v11, %v1244_v11  ;;  %v309_v18 = vld [vmem:[%s1216_s21 + $0x40] sm:$0xff]  ;;  %v1257_v19 = vld [vmem:[%s1216_s21 + $0x38] sm:$0xff]  ;;  %v1260_v20 = vld [vmem:[%s1216_s21 + $0x30] sm:$0xff]  ;;  %s2376_s24 = smov (!%p1077_p5, %s268_s24), %s2374_s23  ;;  %s1453_s6 = scalar_lea.vmem %s2265_s2, %s1081_s30 }
  0x14   : > { %v346_v8 = vsel %vm333_vm0, %v321_v3, 0.0  ;;  %v340_v9 = vsel %vm333_vm0, %v319_v4, 0.0  ;;  %v349_v15 = vsel %vm333_vm0, %v322_v12, 0.0  ;;  %v325_v21 = vmul.f32 %v309_v18, %v309_v18  ;;  %s1078_s25 = sshll.u32 %s2376_s24, 4  ;;  %v312_v27 = vld [vmem:[%s1216_s21 + $0x58] sm:$0xff]  ;;  %v1271_v28 = vld [vmem:[%s1216_s21 + $0x50] sm:$0xff] }
  0x15   : > { %v334_v10 = vsel %vm333_vm0, %v317_v5, 0.0  ;;  %347 = vadd.xlane.f32.xlu2 %v346_v8  ;;  %341 = vadd.xlane.f32.xlu1 %v340_v9  ;;  %v343_v16 = vsel %vm333_vm0, %v320_v13, 0.0  ;;  %v337_v17 = vsel %vm333_vm0, %v318_v14, 0.0  ;;  %v324_v22 = vmul.f32 %v1257_v19, %v1257_v19  ;;  %v1274_v29 = vld [vmem:[%s1216_s21 + $0x48] sm:$0xff]  ;;  %p271_p6 = scmp.lt.s32.totalorder %s1078_s25, 31  ;;  %v315_v36 = vld [vmem:[%s1216_s21 + $0x70] sm:$0xff] }
  0x16   : > { %335 = vadd.xlane.f32.xlu0 %v334_v10  ;;  %v323_v23 = vmul.f32 %v1260_v20, %v1260_v20  ;;  %v358_v24 = vsel %vm333_vm0, %v325_v21, 0.0  ;;  %v328_v30 = vmul.f32 %v312_v27, %v312_v27  ;;  %v327_v31 = vmul.f32 %v1271_v28, %v1271_v28  ;;  %v314_v37 = vld [vmem:[%s1216_s21 + $0x68] sm:$0xff]  ;;  %v313_v38 = vld [vmem:[%s1216_s21 + $0x60] sm:$0xff]  ;;  %v316_v47 = vld [vmem:[%s1216_s21 + $0x78] sm:$0xff] }
  0x17   : > { %v355_v25 = vsel %vm333_vm0, %v324_v22, 0.0  ;;  %v326_v32 = vmul.f32 %v1274_v29, %v1274_v29  ;;  %s2378_s25 = smov (!%p271_p6, %s1078_s25), 31  ;;  %v331_v39 = vmul.f32 %v315_v36, %v315_v36  ;;  %v330_v40 = vmul.f32 %v314_v37, %v314_v37 }
  0x18   : > { %v352_v26 = vsel %vm333_vm0, %v323_v23, 0.0  ;;  %v367_v33 = vsel %vm333_vm0, %v328_v30, 0.0  ;;  %v364_v34 = vsel %vm333_vm0, %v327_v31, 0.0  ;;  %s1079_s26 = sshll.u32 %s2378_s25, 3  ;;  %v329_v41 = vmul.f32 %v313_v38, %v313_v38 }
  0x19   : > { %v361_v35 = vsel %vm333_vm0, %v326_v32, 0.0  ;;  %s1289_s29 = scalar_lea.vmem %s2264_s1, %s1079_s26  ;;  %v376_v42 = vsel %vm333_vm0, %v331_v39, 0.0  ;;  %v373_v43 = vsel %vm333_vm0, %v330_v40, 0.0  ;;  %v332_v50 = vmul.f32 %v316_v47, %v316_v47 }
  0x1a   : > { %v370_v44 = vsel %vm333_vm0, %v329_v41, 0.0  ;;  %v1295_v45 = vld [vmem:[%s1289_s29 + $0x8] sm:$0xff]  ;;  %v1298_v46 = vld [vmem:[%s1289_s29] sm:$0xff]  ;;  %v1312_v55 = vld [vmem:[%s1289_s29 + $0x18] sm:$0xff] }
  0x1b   : > { %v591_v48 = vmul.f32 %v1295_v45, %v1295_v45  ;;  %v590_v49 = vmul.f32 %v1298_v46, %v1298_v46  ;;  %v379_v53 = vsel %vm333_vm0, %v332_v50, 0.0  ;;  %v1309_v54 = vld [vmem:[%s1289_s29 + $0x20] sm:$0xff]  ;;  %v1315_v56 = vld [vmem:[%s1289_s29 + $0x10] sm:$0xff]  ;;  %v593_v58 = vmul.f32 %v1312_v55, %v1312_v55  ;;  %v1327_v63 = vld [vmem:[%s1289_s29 + $0x38] sm:$0xff] }
  0x1c   : > { %v594_v57 = vmul.f32 %v1309_v54, %v1309_v54  ;;  %v592_v59 = vmul.f32 %v1315_v56, %v1315_v56  ;;  %v1330_v3 = vld [vmem:[%s1289_s29 + $0x30] sm:$0xff]  ;;  %v1333_v4 = vld [vmem:[%s1289_s29 + $0x28] sm:$0xff]  ;;  %v597_v5 = vmul.f32 %v1327_v63, %v1327_v63  ;;  %v585_v27 = vld [vmem:[%s1289_s29 + $0x58] sm:$0xff] }
  0x1d   : > { %350 = vadd.xlane.f32.xlu2 %v349_v15  ;;  %344 = vadd.xlane.f32.xlu1 %v343_v16  ;;  %v609_v51 = vsel %vm333_vm0, %v591_v48, 0.0  ;;  %v606_v52 = vsel %vm333_vm0, %v590_v49, 0.0  ;;  %v615_v61 = vsel %vm333_vm0, %v593_v58, 0.0  ;;  %v596_v8 = vmul.f32 %v1330_v3, %v1330_v3  ;;  %v1345_v14 = vld [vmem:[%s1289_s29 + $0x50] sm:$0xff]  ;;  %v1348_v15 = vld [vmem:[%s1289_s29 + $0x48] sm:$0xff]  ;;  %v1351_v16 = vld [vmem:[%s1289_s29 + $0x40] sm:$0xff] }
  0x1e   : > { %338 = vadd.xlane.f32.xlu0 %v337_v17  ;;  %v618_v60 = vsel %vm333_vm0, %v594_v57, 0.0  ;;  %v612_v62 = vsel %vm333_vm0, %v592_v59, 0.0  ;;  %v595_v9 = vmul.f32 %v1333_v4, %v1333_v4  ;;  %v627_v10 = vsel %vm333_vm0, %v597_v5, 0.0  ;;  %2276 = vst [vmem:[#allocation2_spill] sm:$0xff] %v1351_v16  ;;  %v589_v36 = vld [vmem:[%s1289_s29 + $0x78] sm:$0xff]  ;;  %v588_v37 = vld [vmem:[%s1289_s29 + $0x70] sm:$0xff] }
  0x1f   : > { %v624_v12 = vsel %vm333_vm0, %v596_v8, 0.0  ;;  %v600_v17 = vmul.f32 %v1345_v14, %v1345_v14  ;;  %v599_v18 = vmul.f32 %v1348_v15, %v1348_v15  ;;  %v598_v21 = vmul.f32 %v1351_v16, %v1351_v16 }
  0x20   : > { %v621_v13 = vsel %vm333_vm0, %v595_v9, 0.0  ;;  %v601_v32 = vmul.f32 %v585_v27, %v585_v27  ;;  %v605_v38 = vmul.f32 %v589_v36, %v589_v36  ;;  %v604_v39 = vmul.f32 %v588_v37, %v588_v37 }
  0x21   : > { %v636_v22 = vsel %vm333_vm0, %v600_v17, 0.0  ;;  %v633_v23 = vsel %vm333_vm0, %v599_v18, 0.0 }
  0x22   : > { %v651_v40 = vsel %vm333_vm0, %v605_v38, 0.0  ;;  %v648_v41 = vsel %vm333_vm0, %v604_v39, 0.0 }
  0x25   : > { %359 = vadd.xlane.f32.xlu2 %v358_v24  ;;  %356 = vadd.xlane.f32.xlu1 %v355_v25  ;;  %v630_v24 = vsel %vm333_vm0, %v598_v21, 0.0  ;;  %v1363_v25 = vld [vmem:[%s1289_s29 + $0x68] sm:$0xff] }
  0x26   : > { %353 = vadd.xlane.f32.xlu0 %v352_v26  ;;  %2277 = vst [vmem:[#allocation3_spill] sm:$0xff] %v1363_v25  ;;  %v586_v26 = vld [vmem:[%s1289_s29 + $0x60] sm:$0xff]  ;;  %v603_v30 = vmul.f32 %v1363_v25, %v1363_v25 }
  0x27   : > { %v602_v31 = vmul.f32 %v586_v26, %v586_v26 }
  0x2d   : > { %368 = vadd.xlane.f32.xlu2 %v367_v33  ;;  %365 = vadd.xlane.f32.xlu1 %v364_v34  ;;  %v645_v33 = vsel %vm333_vm0, %v603_v30, 0.0  ;;  %v642_v34 = vsel %vm333_vm0, %v602_v31, 0.0 }
  0x2e   : > { %362 = vadd.xlane.f32.xlu0 %v361_v35  ;;  %v639_v35 = vsel %vm333_vm0, %v601_v32, 0.0 }
  0x35   : > { %377 = vadd.xlane.f32.xlu2 %v376_v42  ;;  %374 = vadd.xlane.f32.xlu1 %v373_v43 }
  0x36   : > { %371 = vadd.xlane.f32.xlu0 %v370_v44 }
  0x3d   : > { %610 = vadd.xlane.f32.xlu2 %v609_v51  ;;  %607 = vadd.xlane.f32.xlu1 %v606_v52 }
  0x3e   : > { %380 = vadd.xlane.f32.xlu0 %v379_v53 }
  0x45   : > { %619 = vadd.xlane.f32.xlu2 %v618_v60  ;;  %616 = vadd.xlane.f32.xlu1 %v615_v61 }
  0x46   : > { %613 = vadd.xlane.f32.xlu0 %v612_v62 }
  0x4d   : > { %628 = vadd.xlane.f32.xlu2 %v627_v10  ;;  %625 = vadd.xlane.f32.xlu1 %v624_v12 }
  0x4e   : > { %622 = vadd.xlane.f32.xlu0 %v621_v13 }
  0x55   : > { %637 = vadd.xlane.f32.xlu2 %v636_v22  ;;  %634 = vadd.xlane.f32.xlu1 %v633_v23 }
  0x56   : > { %631 = vadd.xlane.f32.xlu0 %v630_v24 }
  0x5d   : > { %646 = vadd.xlane.f32.xlu2 %v645_v33  ;;  %643 = vadd.xlane.f32.xlu1 %v642_v34 }
  0x5e   : > { %640 = vadd.xlane.f32.xlu0 %v639_v35 }
  0x65   : > { %652 = vadd.xlane.f32.xlu1 %v651_v40 }
  0x66   : > { %649 = vadd.xlane.f32.xlu0 %v648_v41 }
  0x88   : > { %v348_v42 = vpop.xlane.xlu2 %347  ;;  %v342_v43 = vpop.xlane.xlu1 %341 }
  0x89   : > { %v1376_v44 = vmax.f32 %v348_v42, 1e-24  ;;  %v1378_v47 = vmax.f32 %v342_v43, 1e-24  ;;  %v336_v48 = vpop.xlane.xlu0 %335 }
  0x8a   : > { %v382_v49 = vmax.f32 %v336_v48, 1e-24 }
  0x8b   : > { %1094 = vrsqrt.f32 %v1376_v44  ;;  %vm444_vm5 = vweird.f32 %v1376_v44  ;;  %vm424_vm11 = vweird.f32 %v1378_v47 }
  0x8c   : > { %1096 = vrsqrt.f32 %v1378_v47  ;;  %vm404_vm2 = vweird.f32 %v382_v49 }
  0x8d   : > { %1098 = vrsqrt.f32 %v382_v49 }
  0x90   : > { %v351_v50 = vpop.xlane.xlu2 %350  ;;  %v345_v51 = vpop.xlane.xlu1 %344 }
  0x91   : > { %v1382_v52 = vpop.eup %1094  ;;  %v1384_v53 = vmax.f32 %v345_v51, 1e-24  ;;  %v339_v57 = vpop.xlane.xlu0 %338  ;;  %v1406_v27 = vmax.f32 %v351_v50, 1e-24 }
  0x92   : > { %v1386_v58 = vpop.eup %1096  ;;  %v1388_v59 = vmax.f32 %v339_v57, 1e-24  ;;  %v439_v61 = vmul.f32 %v1382_v52, %v1376_v44  ;;  %vm445_vm6 = vweird.f32 %v1382_v52 }
  0x93   : > { %v1099_v60 = vpop.eup %1098  ;;  %1100 = vrsqrt.f32 %v1384_v53  ;;  %v419_v5 = vmul.f32 %v1386_v58, %v1378_v47  ;;  %vm425_vm7 = vweird.f32 %v1386_v58  ;;  %vm1463_vm10 = vmor %vm444_vm5, %vm445_vm6  ;;  %vm434_vm15 = vweird.f32 %v1384_v53 }
  0x94   : > { %v399_v62 = vmul.f32 %v1099_v60, %v382_v49  ;;  %1102 = vrsqrt.f32 %v1388_v59  ;;  %v440_v9 = vmul.f32 %v1382_v52, %v439_v61  ;;  %vm405_vm1 = vweird.f32 %v1099_v60  ;;  %vm1481_vm13 = vmor %vm424_vm11, %vm425_vm7 }
  0x95   : > { %v420_v17 = vmul.f32 %v1386_v58, %v419_v5  ;;  %vm1416_vm3 = vmor %vm404_vm2, %vm405_vm1  ;;  %vm414_vm9 = vweird.f32 %v1388_v59 }
  0x96   : > { %v400_v8 = vmul.f32 %v1099_v60, %v399_v62  ;;  %v441_v31 = vmul.f32 0.5, %v440_v9 }
  0x97   : > { %v421_v33 = vmul.f32 0.5, %v420_v17 }
  0x98   : > { %v401_v10 = vmul.f32 0.5, %v400_v8  ;;  %v360_v12 = vpop.xlane.xlu2 %359  ;;  %v357_v13 = vpop.xlane.xlu1 %356  ;;  %v442_v39 = vsub.f32 1.5, %v441_v31 }
  0x99   : > { %v1398_v18 = vmax.f32 %v357_v13, 1e-24  ;;  %v354_v21 = vpop.xlane.xlu0 %353  ;;  %v1400_v22 = vpop.eup %1100  ;;  %v1420_v38 = vmax.f32 %v360_v12, 1e-24  ;;  %v422_v48 = vsub.f32 1.5, %v421_v33 }
  0x9a   : > { %v402_v23 = vsub.f32 1.5, %v401_v10  ;;  %v1402_v24 = vmax.f32 %v354_v21, 1e-24  ;;  %v1404_v26 = vpop.eup %1102  ;;  %v429_v30 = vmul.f32 %v1400_v22, %v1384_v53  ;;  %vm435_vm14 = vweird.f32 %v1400_v22 }
  0x9b   : > { %v409_v32 = vmul.f32 %v1404_v26, %v1388_v59  ;;  %1104 = vrsqrt.f32 %v1398_v18  ;;  %vm415_vm8 = vweird.f32 %v1404_v26  ;;  %v423_v13 = vmul.f32 %v1386_v58, %v422_v48  ;;  %vm436_vm1 = vmor %vm434_vm15, %vm435_vm14 }
  0x9c   : > { %v430_v34 = vmul.f32 %v1400_v22, %v429_v30  ;;  %1106 = vrsqrt.f32 %v1402_v24  ;;  %v403_v36 = vmul.f32 %v1099_v60, %v402_v23  ;;  %vm1474_vm12 = vmor %vm414_vm9, %vm415_vm8  ;;  %vm474_vm2 = vweird.f32 %v1398_v18 }
  0x9d   : > { %v410_v35 = vmul.f32 %v1404_v26, %v409_v32  ;;  %1108 = vrsqrt.f32 %v1406_v27  ;;  %vm464_vm9 = vweird.f32 %v1402_v24 }
  0x9e   : > { %v407_v43 = vsel %vm1416_vm3, %v1099_v60, %v403_v36  ;;  %v431_v49 = vmul.f32 0.5, %v430_v34  ;;  %1110 = vrsqrt.f32 %v1420_v38  ;;  %vm454_vm3 = vweird.f32 %v1406_v27 }
  0x9f   : > { %v411_v40 = vmul.f32 0.5, %v410_v35  ;;  %v1436_v8 = vmul.f32 %v407_v43, %v1225_v2  ;;  %v443_v2 = vmul.f32 %v1382_v52, %v442_v39 }
  0xa0   : > { %v369_v41 = vpop.xlane.xlu2 %368  ;;  %v366_v42 = vpop.xlane.xlu1 %365  ;;  %v432_v23 = vsub.f32 1.5, %v431_v49 }
  0xa1   : > { %v1426_v50 = vmax.f32 %v366_v42, 1e-24  ;;  %v363_v51 = vpop.xlane.xlu0 %362  ;;  %v1428_v57 = vpop.eup %1104  ;;  %v412_v61 = vsub.f32 1.5, %v411_v40  ;;  %v1431_v62 = vmax.f32 %v369_v41, 1e-24  ;;  %v927_v59 = vpack.c.bf16 %v1436_v8, %v1436_v8 }
  0xa2   : > { %v1433_v5 = vmax.f32 %v363_v51, 1e-24  ;;  %v1438_v9 = vpop.eup %1106  ;;  %v469_v60 = vmul.f32 %v1428_v57, %v1398_v18  ;;  %v447_v35 = vsel %vm1463_vm10, %v1382_v52, %v443_v2  ;;  %v427_v42 = vsel %vm1481_vm13, %v1386_v58, %v423_v13 }
  0xa3   : > { %v459_v10 = vmul.f32 %v1438_v9, %v1402_v24  ;;  %1112 = vrsqrt.f32 %v1426_v50  ;;  %v1459_v17 = vpop.eup %1108  ;;  %v413_v30 = vmul.f32 %v1404_v26, %v412_v61  ;;  %944 = vst.msk [vmem:[%s1453_s6] sm:$0xf] %vm2275_vm4, %v927_v59  ;;  %v433_v48 = vmul.f32 %v1400_v22, %v432_v23 }
  0xa4   : > { %v470_v12 = vmul.f32 %v1428_v57, %v469_v60  ;;  %1114 = vrsqrt.f32 %v1433_v5  ;;  %v1493_v36 = vpop.eup %1110  ;;  %v449_v37 = vmul.f32 %v1459_v17, %v1406_v27  ;;  %v1515_v61 = vmul.f32 %v447_v35, %v1219_v0 }
  0xa5   : > { %1116 = vrsqrt.f32 %v1431_v62  ;;  %v460_v44 = vmul.f32 %v1438_v9, %v459_v10  ;;  %v417_v47 = vsel %vm1474_vm12, %v1404_v26, %v413_v30  ;;  %v479_v0 = vmul.f32 %v1493_v36, %v1420_v38 }
  0xa6   : > { %v471_v39 = vmul.f32 0.5, %v470_v12  ;;  %v1508_v52 = vmul.f32 %v417_v47, %v1244_v11  ;;  %v1525_v11 = vmul.f32 %v427_v42, %v1222_v1  ;;  %v450_v2 = vmul.f32 %v1459_v17, %v449_v37 }
  0xa7   : > { %v461_v51 = vmul.f32 0.5, %v460_v44  ;;  %v437_v21 = vsel %vm436_vm1, %v1400_v22, %v433_v48  ;;  %v931_v30 = vpack.c.bf16 %v1515_v61, %v1515_v61  ;;  %vm475_vm5 = vweird.f32 %v1428_v57 }
  0xa8   : > { %v378_v33 = vpop.xlane.xlu2 %377  ;;  %v375_v34 = vpop.xlane.xlu1 %374  ;;  %v472_v53 = vsub.f32 1.5, %v471_v39  ;;  %v928_v13 = vpack.c.bf16 %v1508_v52, %v1508_v52  ;;  %v1539_v59 = vmul.f32 %v437_v21, %v1238_v7  ;;  %v929_v22 = vpack.c.bf16 %v1525_v11, %v1525_v11  ;;  %vm476_vm8 = vmor %vm474_vm2, %vm475_vm5 }
  0xa9   : > { %v1497_v40 = vmax.f32 %v378_v33, 1e-24  ;;  %v372_v41 = vpop.xlane.xlu0 %371  ;;  %v1502_v43 = vpop.eup %1112  ;;  %v1505_v26 = vmax.f32 %v375_v34, 1e-24  ;;  %v462_v23 = vsub.f32 1.5, %v461_v51  ;;  %v451_v7 = vmul.f32 0.5, %v450_v2 }
  0xaa   : > { %v1511_v49 = vpop.eup %1114  ;;  %v499_v60 = vmul.f32 %v1502_v43, %v1426_v50  ;;  %v1531_v12 = vmax.f32 %v372_v41, 1e-24  ;;  %945 = vst.msk [vmem:[%s1453_s6 + $0x4] sm:$0xf] %vm2275_vm4, %v928_v13  ;;  %v930_v37 = vpack.c.bf16 %v1539_v59, %v1539_v59  ;;  %v480_v41 = vmul.f32 %v1493_v36, %v479_v0 }
  0xab   : > { %v1517_v58 = vpop.eup %1116  ;;  %v489_v10 = vmul.f32 %v1511_v49, %v1433_v5  ;;  %1118 = vrsqrt.f32 %v1497_v40  ;;  %948 = vst.msk [vmem:[%s1453_s6 + $0x10] sm:$0xf] %vm2275_vm4, %v931_v30  ;;  %v473_v42 = vmul.f32 %v1428_v57, %v472_v53  ;;  %vm465_vm6 = vweird.f32 %v1438_v9 }
  0xac   : > { %1120 = vrsqrt.f32 %v1505_v26  ;;  %v509_v1 = vmul.f32 %v1517_v58, %v1431_v62  ;;  %v500_v31 = vmul.f32 %v1502_v43, %v499_v60  ;;  %947 = vst.msk [vmem:[%s1453_s6 + $0xc] sm:$0xf] %vm2275_vm4, %v930_v37  ;;  %v463_v51 = vmul.f32 %v1438_v9, %v462_v23  ;;  %vm1590_vm10 = vmor %vm464_vm9, %vm465_vm6 }
  0xad   : > { %v490_v44 = vmul.f32 %v1511_v49, %v489_v10  ;;  %1122 = vrsqrt.f32 %v1531_v12  ;;  %946 = vst.msk [vmem:[%s1453_s6 + $0x8] sm:$0xf] %vm2275_vm4, %v929_v22  ;;  %v452_v53 = vsub.f32 1.5, %v451_v7  ;;  %vm455_vm7 = vweird.f32 %v1459_v17 }
  0xae   : > { %v510_v48 = vmul.f32 %v1517_v58, %v509_v1  ;;  %v501_v10 = vmul.f32 0.5, %v500_v31  ;;  %v1586_v21 = vmul.f32 0.5, %v480_v41  ;;  %vm504_vm11 = vweird.f32 %v1426_v50  ;;  %vm456_vm14 = vmor %vm454_vm3, %vm455_vm7 }
  0xaf   : > { %v491_v2 = vmul.f32 0.5, %v490_v44  ;;  %vm505_vm12 = vweird.f32 %v1502_v43  ;;  %v477_v18 = vsel %vm476_vm8, %v1428_v57, %v473_v42  ;;  %vm495_vm13 = vweird.f32 %v1511_v49 }
  0xb0   : > { %v611_v32 = vpop.xlane.xlu2 %610  ;;  %v608_v33 = vpop.xlane.xlu1 %607  ;;  %v1601_v1 = vmul.f32 %v477_v18, %v1257_v19  ;;  %v467_v30 = vsel %vm1590_vm10, %v1438_v9, %v463_v51  ;;  %v1608_v44 = vmul.f32 0.5, %v510_v48  ;;  %vm494_vm15 = vweird.f32 %v1433_v5  ;;  %vm1657_vm1 = vmor %vm504_vm11, %vm505_vm12 }
  0xb1   : > { %v1550_v34 = vmax.f32 %v611_v32, 1e-24  ;;  %v1552_v47 = vmax.f32 %v608_v33, 1e-24  ;;  %v381_v35 = vpop.xlane.xlu0 %380  ;;  %v1556_v39 = vpop.eup %1118  ;;  %v502_v32 = vsub.f32 1.5, %v501_v10  ;;  %v492_v33 = vsub.f32 1.5, %v491_v2  ;;  %vm1666_vm2 = vmor %vm494_vm15, %vm495_vm13 }
  0xb2   : > { %v1571_v60 = vpop.eup %1120  ;;  %v1574_v0 = vmax.f32 %v381_v35, 1e-24  ;;  %v539_v13 = vmul.f32 %v1556_v39, %v1497_v40  ;;  %2288 = vst [vmem:[#allocation4_spill] sm:$0xff] %v1608_v44  ;;  %v934_v41 = vpack.c.bf16 %v1601_v1, %v1601_v1  ;;  %v1627_v10 = vmul.f32 %v467_v30, %v1260_v20 }
  0xb3   : > { %1124 = vrsqrt.f32 %v1550_v34  ;;  %v529_v24 = vmul.f32 %v1571_v60, %v1505_v26  ;;  %v1606_v31 = vpop.eup %1122  ;;  %v453_v2 = vmul.f32 %v1459_v17, %v452_v53  ;;  %v503_v20 = vmul.f32 %v1502_v43, %v502_v32 }
  0xb4   : > { %1126 = vrsqrt.f32 %v1552_v47  ;;  %v540_v19 = vmul.f32 %v1556_v39, %v539_v13  ;;  %v519_v23 = vmul.f32 %v1606_v31, %v1531_v12  ;;  %951 = vst.msk [vmem:[%s1453_s6 + $0x1c] sm:$0xf] %vm2275_vm4, %v934_v41  ;;  %v493_v53 = vmul.f32 %v1511_v49, %v492_v33 }
  0xb5   : > { %1128 = vrsqrt.f32 %v1574_v0  ;;  %v530_v13 = vmul.f32 %v1571_v60, %v529_v24  ;;  %v933_v5 = vpack.c.bf16 %v1627_v10, %v1627_v10  ;;  %vm686_vm3 = vweird.f32 %v1550_v34 }
  0xb6   : > { %v520_v32 = vmul.f32 %v1606_v31, %v519_v23  ;;  %vm676_vm7 = vweird.f32 %v1552_v47 }
  0xb7   : > { %950 = vst.msk [vmem:[%s1453_s6 + $0x18] sm:$0xf] %vm2275_vm4, %v933_v5 }
  0xb8   : > { %v620_v57 = vpop.xlane.xlu2 %619  ;;  %v617_v22 = vpop.xlane.xlu1 %616 }
  0xb9   : > { %v1611_v7 = vpop.eup %1124  ;;  %v1614_v35 = vmax.f32 %v620_v57, 1e-24  ;;  %v1616_v37 = vmax.f32 %v617_v22, 1e-24  ;;  %v614_v9 = vpop.xlane.xlu0 %613 }
  0xba   : > { %v1620_v42 = vpop.eup %1126  ;;  %v681_v48 = vmul.f32 %v1611_v7, %v1550_v34  ;;  %v1624_v51 = vmax.f32 %v614_v9, 1e-24  ;;  %v457_v9 = vsel %vm456_vm14, %v1459_v17, %v453_v2  ;;  %v507_v2 = vsel %vm1657_vm1, %v1502_v43, %v503_v20 }
  0xbb   : > { %v671_v18 = vmul.f32 %v1620_v42, %v1552_v47  ;;  %1130 = vrsqrt.f32 %v1614_v35  ;;  %v1650_v22 = vpop.eup %1128  ;;  %vm677_vm5 = vweird.f32 %v1620_v42  ;;  %vm687_vm6 = vweird.f32 %v1611_v7 }
  0xbc   : > { %v682_v57 = vmul.f32 %v1611_v7, %v681_v48  ;;  %1132 = vrsqrt.f32 %v1616_v37  ;;  %v1670_v48 = vmul.f32 0.5, %v540_v19  ;;  %v497_v19 = vsel %vm1666_vm2, %v1511_v49, %v493_v53  ;;  %vm1730_vm8 = vmor %vm676_vm7, %vm677_vm5 }
  0xbd   : > { %v672_v30 = vmul.f32 %v1620_v42, %v671_v18  ;;  %1134 = vrsqrt.f32 %v1624_v51  ;;  %v1674_v18 = vmul.f32 %v457_v9, %v1235_v6  ;;  %v549_v6 = vmul.f32 %v1650_v22, %v1574_v0  ;;  %vm1760_vm10 = vmor %vm686_vm3, %vm687_vm6 }
  0xbe   : > { %v683_v33 = vmul.f32 0.5, %v682_v57  ;;  %2293 = vst [vmem:[#allocation5_spill] sm:$0xff] %v1670_v48  ;;  %v1676_v57 = vmul.f32 0.5, %v530_v13  ;;  %vm716_vm9 = vweird.f32 %v1614_v35  ;;  %vm706_vm11 = vweird.f32 %v1616_v37 }
  0xbf   : > { %v673_v50 = vmul.f32 0.5, %v672_v30  ;;  %2294 = vst [vmem:[#allocation6_spill] sm:$0xff] %v1674_v18  ;;  %v932_v5 = vpack.c.bf16 %v1674_v18, %v1674_v18  ;;  %v550_v25 = vmul.f32 %v1650_v22, %v549_v6  ;;  %vm696_vm12 = vweird.f32 %v1624_v51 }
  0xc0   : > { %v629_v24 = vpop.xlane.xlu2 %628  ;;  %v626_v17 = vpop.xlane.xlu1 %625  ;;  %v684_v43 = vsub.f32 1.5, %v683_v33  ;;  %v1714_v33 = vmul.f32 %v497_v19, %v1274_v29 }
  0xc1   : > { %v1687_v30 = vpop.eup %1130  ;;  %v1691_v13 = vmax.f32 %v629_v24, 1e-24  ;;  %v1693_v23 = vmax.f32 %v626_v17, 1e-24  ;;  %v623_v9 = vpop.xlane.xlu0 %622  ;;  %v674_v20 = vsub.f32 1.5, %v673_v50  ;;  %v1711_v17 = vmul.f32 %v507_v2, %v1271_v28 }
  0xc2   : > { %v1697_v27 = vpop.eup %1132  ;;  %v711_v49 = vmul.f32 %v1687_v30, %v1614_v35  ;;  %v1701_v53 = vmax.f32 %v623_v9, 1e-24  ;;  %949 = vst.msk [vmem:[%s1453_s6 + $0x14] sm:$0xf] %vm2275_vm4, %v932_v5  ;;  %v1716_v50 = vmul.f32 0.5, %v520_v32  ;;  %v685_v19 = vmul.f32 %v1611_v7, %v684_v43 }
  0xc3   : > { %v1703_v41 = vpop.eup %1134  ;;  %v701_v24 = vmul.f32 %v1697_v27, %v1616_v37  ;;  %1136 = vrsqrt.f32 %v1691_v13  ;;  %2295 = vst [vmem:[#allocation7_spill] sm:$0xff] %v1711_v17  ;;  %v675_v29 = vmul.f32 %v1620_v42, %v674_v20  ;;  %v937_v6 = vpack.c.bf16 %v1711_v17, %v1711_v17 }
  0xc4   : > { %2296 = vst [vmem:[#allocation8_spill] sm:$0xff] %v1716_v50  ;;  %v691_v9 = vmul.f32 %v1703_v41, %v1624_v51  ;;  %1138 = vrsqrt.f32 %v1693_v23  ;;  %v712_v44 = vmul.f32 %v1687_v30, %v711_v49  ;;  %v936_v49 = vpack.c.bf16 %v1714_v33, %v1714_v33 }
  0xc5   : > { %v702_v5 = vmul.f32 %v1697_v27, %v701_v24  ;;  %1140 = vrsqrt.f32 %v1701_v53  ;;  %v1747_v18 = vmul.f32 0.5, %v550_v25  ;;  %954 = vst.msk [vmem:[%s1453_s6 + $0x28] sm:$0xf] %vm2275_vm4, %v937_v6  ;;  %vm707_vm13 = vweird.f32 %v1697_v27 }
  0xc6   : > { %v692_v28 = vmul.f32 %v1703_v41, %v691_v9  ;;  %v713_v17 = vmul.f32 0.5, %v712_v44  ;;  %953 = vst.msk [vmem:[%s1453_s6 + $0x24] sm:$0xf] %vm2275_vm4, %v936_v49  ;;  %vm717_vm14 = vweird.f32 %v1687_v30  ;;  %vm697_vm15 = vweird.f32 %v1703_v41  ;;  %vm1809_vm1 = vmor %vm706_vm11, %vm707_vm13 }
  0xc7   : > { %v703_v2 = vmul.f32 0.5, %v702_v5  ;;  %v679_v5 = vsel %vm1730_vm8, %v1620_v42, %v675_v29  ;;  %2299 = vst [vmem:[#allocation9_spill] sm:$0xff] %v1747_v18  ;;  %vm746_vm2 = vweird.f32 %v1691_v13  ;;  %vm1840_vm6 = vmor %vm716_vm9, %vm717_vm14  ;;  %vm736_vm8 = vweird.f32 %v1693_v23 }
  0xc8   : > { %v638_v20 = vpop.xlane.xlu2 %637  ;;  %v635_v16 = vpop.xlane.xlu1 %634  ;;  %v693_v25 = vmul.f32 0.5, %v692_v28  ;;  %v689_v28 = vsel %vm1760_vm10, %v1611_v7, %v685_v19  ;;  %v714_v6 = vsub.f32 1.5, %v713_v17  ;;  %vm1852_vm7 = vmor %vm696_vm12, %vm697_vm15  ;;  %vm726_vm10 = vweird.f32 %v1701_v53 }
  0xc9   : > { %v1745_v43 = vpop.eup %1136  ;;  %v1750_v24 = vmax.f32 %v638_v20, 1e-24  ;;  %v1752_v47 = vmax.f32 %v635_v16, 1e-24  ;;  %v632_v9 = vpop.xlane.xlu0 %631  ;;  %v830_v16 = vmul.f32 %v679_v5, %v1298_v46  ;;  %v704_v20 = vsub.f32 1.5, %v703_v2 }
  0xca   : > { %v1754_v48 = vpop.eup %1138  ;;  %v741_v44 = vmul.f32 %v1745_v43, %v1691_v13  ;;  %v1766_v29 = vmax.f32 %v632_v9, 1e-24  ;;  %v694_v7 = vsub.f32 1.5, %v693_v25  ;;  %v831_v49 = vmul.f32 %v689_v28, %v1295_v45 }
  0xcb   : > { %v1771_v32 = vpop.eup %1140  ;;  %v731_v34 = vmul.f32 %v1754_v48, %v1693_v23  ;;  %1142 = vrsqrt.f32 %v1750_v24  ;;  %v846_v19 = vmul.f32 %v830_v16, %v1436_v8  ;;  %v705_v17 = vmul.f32 %v1697_v27, %v704_v20 }
  0xcc   : > { %v742_v46 = vmul.f32 %v1745_v43, %v741_v44  ;;  %1144 = vrsqrt.f32 %v1752_v47  ;;  %v721_v9 = vmul.f32 %v1771_v32, %v1701_v53  ;;  %v847_v2 = vmul.f32 %v831_v49, %v1508_v52  ;;  %v2333_v53 = vld [vmem:[#allocation2_spill] sm:$0xff] }
  0xcd   : > { %1146 = vrsqrt.f32 %v1766_v29  ;;  %v732_v5 = vmul.f32 %v1754_v48, %v731_v34  ;;  %v862_v44 = vsel %vm333_vm0, %v846_v19, 0.0  ;;  %v2302_v25 = vsub.f32 1.5, %v1586_v21 }
  0xce   : > { %v743_v42 = vmul.f32 0.5, %v742_v46  ;;  %vm747_vm3 = vweird.f32 %v1745_v43  ;;  %v722_v52 = vmul.f32 %v1771_v32, %v721_v9  ;;  %863 = vadd.xlane.f32.xlu2 %v862_v44  ;;  %v715_v28 = vmul.f32 %v1687_v30, %v714_v6 }
  0xcf   : > { %v1801_v8 = vmul.f32 %v1493_v36, %v2302_v25  ;;  %v865_v19 = vsel %vm333_vm0, %v847_v2, 0.0  ;;  %v709_v49 = vsel %vm1809_vm1, %v1697_v27, %v705_v17  ;;  %v695_v9 = vmul.f32 %v1703_v41, %v694_v7  ;;  %vm1908_vm1 = vmor %vm746_vm2, %vm747_vm3 }
  0xd0   : > { %v647_v18 = vpop.xlane.xlu2 %646  ;;  %v644_v50 = vpop.xlane.xlu1 %643  ;;  %vm737_vm5 = vweird.f32 %v1754_v48  ;;  %866 = vadd.xlane.f32.xlu0 %v865_v19  ;;  %v744_v27 = vsub.f32 1.5, %v743_v42  ;;  %v1857_v35 = vmul.f32 0.5, %v722_v52  ;;  %v833_v25 = vmul.f32 %v709_v49, %v1312_v55 }
  0xd1   : > { %v1803_v45 = vpop.eup %1142  ;;  %v1816_v21 = vmax.f32 %v647_v18, 1e-24  ;;  %v1818_v20 = vmax.f32 %v644_v50, 1e-24  ;;  %v641_v34 = vpop.xlane.xlu0 %640  ;;  %v733_v50 = vmul.f32 0.5, %v732_v5  ;;  %vm776_vm9 = vweird.f32 %v1750_v24  ;;  %vm1932_vm3 = vmor %vm736_vm8, %vm737_vm5 }
  0xd2   : > { %v1821_v46 = vpop.eup %1144  ;;  %v771_v37 = vmul.f32 %v1803_v45, %v1750_v24  ;;  %v1860_v44 = vmax.f32 %v641_v34, 1e-24  ;;  %v719_v51 = vsel %vm1840_vm6, %v1687_v30, %v715_v28  ;;  %vm727_vm11 = vweird.f32 %v1771_v32 }
  0xd3   : > { %v1830_v18 = vpop.eup %1146  ;;  %v761_v6 = vmul.f32 %v1821_v46, %v1752_v47  ;;  %1148 = vrsqrt.f32 %v1816_v21  ;;  %v849_v55 = vmul.f32 %v833_v25, %v1539_v59  ;;  %v734_v34 = vsub.f32 1.5, %v733_v50  ;;  %vm1955_vm2 = vmor %vm726_vm10, %vm727_vm11 }
  0xd4   : > { %v772_v7 = vmul.f32 %v1803_v45, %v771_v37  ;;  %v751_v5 = vmul.f32 %v1830_v18, %v1766_v29  ;;  %1150 = vrsqrt.f32 %v1818_v20  ;;  %v699_v37 = vsel %vm1852_vm7, %v1703_v41, %v695_v9 }
  0xd5   : > { %v762_v42 = vmul.f32 %v1821_v46, %v761_v6  ;;  %1152 = vrsqrt.f32 %v1860_v44  ;;  %v834_v49 = vmul.f32 %v719_v51, %v1309_v54  ;;  %v832_v30 = vmul.f32 %v699_v37, %v1315_v56 }
  0xd6   : > { %v1863_v16 = vmul.f32 0.5, %v772_v7  ;;  %v752_v52 = vmul.f32 %v1830_v18, %v751_v5  ;;  %v724_v41 = vsub.f32 1.5, %v1857_v35  ;;  %vm766_vm12 = vweird.f32 %v1752_v47 }
  0xd7   : > { %v1877_v19 = vmul.f32 0.5, %v762_v42  ;;  %v871_v9 = vsel %vm333_vm0, %v849_v55, 0.0  ;;  %v745_v59 = vmul.f32 %v1745_v43, %v744_v27  ;;  %vm484_vm13 = vweird.f32 %v1420_v38 }
  0xd8   : > { %v653_v28 = vpop.xlane.xlu1 %652  ;;  %vm485_vm14 = vweird.f32 %v1493_v36  ;;  %v774_v54 = vsub.f32 1.5, %v1863_v16  ;;  %vm777_vm15 = vweird.f32 %v1803_v45  ;;  %872 = vadd.xlane.f32.xlu2 %v871_v9  ;;  %v850_v5 = vmul.f32 %v834_v49, %v1515_v61 }
  0xd9   : > { %v1881_v6 = vpop.eup %1148  ;;  %v1886_v2 = vmax.f32 %v653_v28, 1e-24  ;;  %v650_v7 = vpop.xlane.xlu0 %649  ;;  %v1898_v17 = vmul.f32 0.5, %v752_v52  ;;  %v848_v35 = vmul.f32 %v832_v30, %v1525_v11  ;;  %v764_v25 = vsub.f32 1.5, %v1877_v19  ;;  %vm1973_vm10 = vmor %vm776_vm9, %vm777_vm15  ;;  %v1158_v28 = vld [vmem:[%s1216_s21 + $0x40] sm:$0xff] }
  0xda   : > { %v1889_v50 = vpop.eup %1150  ;;  %v801_v56 = vmul.f32 %v1881_v6, %v1816_v21  ;;  %v874_v16 = vsel %vm333_vm0, %v850_v5, 0.0  ;;  %v1915_v51 = vmax.f32 %v650_v7, 1e-24  ;;  %v749_v52 = vsel %vm1908_vm1, %v1745_v43, %v745_v59  ;;  %v2337_v5 = vld [vmem:[#allocation8_spill] sm:$0xff] }
  0xdb   : > { %v791_v27 = vmul.f32 %v1889_v50, %v1818_v20  ;;  %1154 = vrsqrt.f32 %v1886_v2  ;;  %v1917_v37 = vpop.eup %1152  ;;  %875 = vadd.xlane.f32.xlu0 %v874_v16  ;;  %v868_v13 = vsel %vm333_vm0, %v848_v35, 0.0  ;;  %v735_v55 = vmul.f32 %v1754_v48, %v734_v34 }
  0xdc   : > { %v802_v61 = vmul.f32 %v1881_v6, %v801_v56  ;;  %vm767_vm4 = vweird.f32 %v1821_v46  ;;  %vm756_vm6 = vweird.f32 %v1766_v29  ;;  %v781_v43 = vmul.f32 %v1917_v37, %v1860_v44  ;;  %869 = vadd.xlane.f32.xlu1 %v868_v13 }
  0xdd   : > { %v792_v11 = vmul.f32 %v1889_v50, %v791_v27  ;;  %1156 = vrsqrt.f32 %v1915_v51  ;;  %v754_v23 = vsub.f32 1.5, %v1898_v17  ;;  %vm757_vm5 = vweird.f32 %v1830_v18  ;;  %vm1985_vm1 = vmor %vm766_vm12, %vm767_vm4 }
  0xde   : > { %v1938_v49 = vmul.f32 0.5, %v802_v61  ;;  %v837_v34 = vmul.f32 %v749_v52, %v1327_v63  ;;  %v739_v30 = vsel %vm1932_vm3, %v1754_v48, %v735_v55  ;;  %vm534_vm8 = vweird.f32 %v1505_v26  ;;  %v2321_v52 = vld [vmem:[#allocation6_spill] sm:$0xff] }
  0xdf   : > { %vm807_vm7 = vweird.f32 %v1881_v6  ;;  %v1961_v9 = vmul.f32 0.5, %v792_v11  ;;  %v782_v63 = vmul.f32 %v1917_v37, %v781_v43  ;;  %v836_v48 = vmul.f32 %v739_v30, %v1330_v3  ;;  %v2324_v43 = vld [vmem:[#allocation7_spill] sm:$0xff] }
  0xe0   : > { %v725_v7 = vmul.f32 %v1771_v32, %v724_v41  ;;  %vm524_vm3 = vweird.f32 %v1531_v12  ;;  %vm797_vm11 = vweird.f32 %v1889_v50  ;;  %v853_v56 = vmul.f32 %v837_v34, %v1601_v1 }
  0xe1   : > { %v1966_v59 = vpop.eup %1154  ;;  %v775_v3 = vmul.f32 %v1803_v45, %v774_v54  ;;  %v765_v41 = vmul.f32 %v1821_v46, %v764_v25  ;;  %v804_v24 = vsub.f32 1.5, %v1938_v49  ;;  %v1990_v17 = vmul.f32 0.5, %v782_v63 }
  0xe2   : > { %vm787_vm9 = vweird.f32 %v1917_v37  ;;  %v821_v1 = vmul.f32 %v1966_v59, %v1886_v2  ;;  %v852_v54 = vmul.f32 %v836_v48, %v1627_v10  ;;  %vm796_vm15 = vweird.f32 %v1818_v20 }
  0xe3   : > { %v883_v27 = vsel %vm333_vm0, %v853_v56, 0.0  ;;  %v729_v47 = vsel %vm1955_vm2, %v1771_v32, %v725_v7  ;;  %v779_v35 = vsel %vm1973_vm10, %v1803_v45, %v775_v3  ;;  %v769_v42 = vsel %vm1985_vm1, %v1821_v46, %v765_v41  ;;  %v2007_v25 = vpop.eup %1156  ;;  %vm2019_vm2 = vmor %vm484_vm13, %vm485_vm14 }
  0xe4   : > { %vm555_vm4 = vweird.f32 %v1650_v22  ;;  %v794_v10 = vsub.f32 1.5, %v1961_v9  ;;  %vm786_vm12 = vweird.f32 %v1860_v44  ;;  %v822_v61 = vmul.f32 %v1966_v59, %v821_v1  ;;  %884 = vadd.xlane.f32.xlu0 %v883_v27  ;;  %vm2044_vm1 = vmor %vm756_vm6, %vm757_vm5 }
  0xe5   : > { %v880_v32 = vsel %vm333_vm0, %v852_v54, 0.0  ;;  %v835_v16 = vmul.f32 %v729_v47, %v1333_v4  ;;  %v784_v46 = vsub.f32 1.5, %v1990_v17  ;;  %v811_v11 = vmul.f32 %v2007_v25, %v1915_v51  ;;  %v1159_v47 = vld [vmem:[%s1216_s21 + $0x68] sm:$0xff] }
  0xe6   : > { %881 = vadd.xlane.f32.xlu2 %v880_v32  ;;  %v840_v4 = vmul.f32 %v779_v35, %v1345_v14  ;;  %v839_v38 = vmul.f32 %v769_v42, %v1348_v15  ;;  %vm554_vm13 = vweird.f32 %v1574_v0  ;;  %v2031_v13 = vmul.f32 0.5, %v822_v61  ;;  %v2345_v61 = vld [vmem:[#allocation4_spill] sm:$0xff] }
  0xe7   : > { %v851_v55 = vmul.f32 %v835_v16, %v2321_v52  ;;  %v487_v19 = vsel %vm2019_vm2, %v1493_v36, %v1801_v8  ;;  %v755_v49 = vmul.f32 %v1830_v18, %v754_v23  ;;  %v812_v15 = vmul.f32 %v2007_v25, %v811_v11  ;;  %v2350_v52 = vld [vmem:[#allocation9_spill] sm:$0xff] }
  0xe8   : > { %v856_v34 = vmul.f32 %v840_v4, %v2324_v43  ;;  %v855_v30 = vmul.f32 %v839_v38, %v1714_v33  ;;  %v566_v9 = vmul.f32 %v1158_v28, %v487_v19  ;;  %vm2325_vm2 = vweird.f32 %v1517_v58  ;;  %v1160_v4 = vld [vmem:[%s1216_s21 + $0x60] sm:$0xff]  ;;  %v2359_v36 = vld [vmem:[#allocation5_spill] sm:$0xff] }
  0xe9   : > { %vm2326_vm14 = vweird.f32 %v1431_v62  ;;  %v824_v29 = vsub.f32 1.5, %v2031_v13  ;;  %vm826_vm6 = vweird.f32 %v1886_v2  ;;  %v877_v8 = vsel %vm333_vm0, %v851_v55, 0.0 }
  0xea   : > { %vm2056_vm10 = vmor %vm2326_vm14, %vm2325_vm2  ;;  %v759_v33 = vsel %vm2044_vm1, %v1830_v18, %v755_v49  ;;  %v2329_v23 = vsub.f32 1.5, %v1676_v57  ;;  %vm2330_vm14 = vweird.f32 %v1571_v60  ;;  %v813_v48 = vmul.f32 0.5, %v812_v15  ;;  %878 = vadd.xlane.f32.xlu1 %v877_v8  ;;  %v1162_v15 = vld [vmem:[%s1216_s21 + $0x58] sm:$0xff] }
  0xeb   : > { %vm2074_vm2 = vmor %vm534_vm8, %vm2330_vm14  ;;  %v892_v7 = vsel %vm333_vm0, %v856_v34, 0.0  ;;  %v889_v18 = vsel %vm333_vm0, %v855_v30, 0.0  ;;  %v838_v57 = vmul.f32 %v759_v33, %v2333_v53  ;;  %vm2334_vm1 = vweird.f32 %v1606_v31  ;;  %v1163_v34 = vld [vmem:[%s1289_s29 + $0x58] sm:$0xff] }
  0xec   : > { %v533_v62 = vmul.f32 %v1571_v60, %v2329_v23  ;;  %vm2085_vm5 = vmor %vm524_vm3, %vm2334_vm1  ;;  %vm816_vm8 = vweird.f32 %v1915_v51  ;;  %v935_v56 = vpack.c.bf16 %v566_v9, %v566_v9  ;;  %v805_v41 = vmul.f32 %v1881_v6, %v804_v24  ;;  %893 = vadd.xlane.f32.xlu0 %v892_v7 }
  0xed   : > { %v2338_v17 = vsub.f32 1.5, %v2337_v5  ;;  %vm2339_vm3 = vweird.f32 %v1816_v21  ;;  %v814_v54 = vsub.f32 1.5, %v813_v48  ;;  %v854_v27 = vmul.f32 %v838_v57, %v566_v9 }
  0xee   : > { %v537_v3 = vsel %vm2074_vm2, %v1571_v60, %v533_v62  ;;  %vm2101_vm14 = vmor %vm2339_vm3, %vm807_vm7  ;;  %v795_v60 = vmul.f32 %v1889_v50, %v794_v10  ;;  %vm2344_vm1 = vcmask 257024   ;;  %v2346_v10 = vsub.f32 1.5, %v2345_v61  ;;  %890 = vadd.xlane.f32.xlu2 %v889_v18  ;;  %v1164_v62 = vld [vmem:[%s1216_s21 + $0x78] sm:$0xff] }
  0xef   : > { %v523_v1 = vmul.f32 %v1606_v31, %v2338_v17  ;;  %v571_v35 = vmul.f32 %v1159_v47, %v537_v3  ;;  %vm2111_vm2 = vmor %vm796_vm15, %vm797_vm11  ;;  %952 = vst.msk [vmem:[%s1453_s6 + $0x20] sm:$0xf] %vm2344_vm1, %v935_v56  ;;  %v809_v21 = vsel %vm2101_vm14, %v1881_v6, %v805_v41  ;;  %v785_v20 = vmul.f32 %v1917_v37, %v784_v46  ;;  %v2349_v6 = vld [vmem:[#allocation3_spill] sm:$0xff] }
  0xf0   : > { %v513_v32 = vmul.f32 %v1517_v58, %v2346_v10  ;;  %vm2131_vm7 = vmor %vm786_vm12, %vm787_vm9  ;;  %v843_v45 = vmul.f32 %v809_v21, %v2349_v6  ;;  %v799_v44 = vsel %vm2111_vm2, %v1889_v50, %v795_v60  ;;  %v2351_v55 = vsub.f32 1.5, %v2350_v52 }
  0xf1   : > { %v527_v42 = vsel %vm2085_vm5, %v1606_v31, %v523_v1  ;;  %v886_v31 = vsel %vm333_vm0, %v854_v27, 0.0  ;;  %v940_v11 = vpack.c.bf16 %v571_v35, %v571_v35  ;;  %v789_v13 = vsel %vm2131_vm7, %v1917_v37, %v785_v20  ;;  %vm2154_vm11 = vmor %vm554_vm13, %vm555_vm4  ;;  %v1167_v1 = vld [vmem:[%s1289_s29 + $0x70] sm:$0xff] }
  0xf2   : > { %v570_v46 = vmul.f32 %v1160_v4, %v527_v42  ;;  %v517_v38 = vsel %vm2056_vm10, %v1517_v58, %v513_v32  ;;  %v553_v19 = vmul.f32 %v1650_v22, %v2351_v55  ;;  %v859_v50 = vmul.f32 %v843_v45, %v571_v35  ;;  %vm2354_vm9 = vmmov %vm2344_vm1  ;;  %v1161_v58 = vld [vmem:[%s1289_s29 + $0x60] sm:$0xff]  ;;  %887 = vadd.xlane.f32.xlu1 %v886_v31 }
  0xf3   : > { %957 = vst.msk [vmem:[%s1453_s6 + $0x34] sm:$0xf] %vm2354_vm9, %v940_v11  ;;  %v842_v14 = vmul.f32 %v1161_v58, %v799_v44  ;;  %v569_v43 = vmul.f32 %v1162_v15, %v517_v38  ;;  %vm2355_vm15 = vweird.f32 %v1556_v39  ;;  %vm2356_vm12 = vweird.f32 %v1497_v40  ;;  %vm2364_vm5 = vmmov %vm2344_vm1 }
  0xf4   : > { %v939_v37 = vpack.c.bf16 %v570_v46, %v570_v46  ;;  %vm2166_vm10 = vmor %vm2356_vm12, %vm2355_vm15  ;;  %v841_v30 = vmul.f32 %v1163_v34, %v789_v13  ;;  %v557_v28 = vsel %vm2154_vm11, %v1650_v22, %v553_v19  ;;  %v825_v9 = vmul.f32 %v1966_v59, %v824_v29 }
  0xf5   : > { %v2360_v8 = vsub.f32 1.5, %v2359_v36  ;;  %vm2361_vm4 = vweird.f32 %v1966_v59  ;;  %v901_v23 = vsel %vm333_vm0, %v859_v50, 0.0  ;;  %v858_v22 = vmul.f32 %v842_v14, %v570_v46  ;;  %vm2368_vm14 = vmmov %vm2344_vm1 }
  0xf6   : > { %vm2182_vm13 = vmor %vm826_vm6, %vm2361_vm4  ;;  %956 = vst.msk [vmem:[%s1453_s6 + $0x30] sm:$0xf] %vm2364_vm5, %v939_v37  ;;  %v938_v29 = vpack.c.bf16 %v569_v43, %v569_v43  ;;  %v573_v63 = vmul.f32 %v1164_v62, %v557_v28  ;;  %v857_v48 = vmul.f32 %v841_v30, %v569_v43  ;;  %v815_v18 = vmul.f32 %v2007_v25, %v814_v54 }
  0xf7   : > { %v543_v33 = vmul.f32 %v1556_v39, %v2360_v8  ;;  %v829_v2 = vsel %vm2182_vm13, %v1966_v59, %v825_v9  ;;  %vm2365_vm6 = vweird.f32 %v2007_v25  ;;  %v898_v57 = vsel %vm333_vm0, %v858_v22, 0.0  ;;  %v1165_v59 = vld [vmem:[%s1289_s29 + $0x78] sm:$0xff]  ;;  %902 = vadd.xlane.f32.xlu0 %v901_v23  ;;  %vm2370_vm2 = vmmov %vm2344_vm1 }
  0xf8   : > { %vm2201_vm3 = vmor %vm816_vm8, %vm2365_vm6  ;;  %955 = vst.msk [vmem:[%s1453_s6 + $0x2c] sm:$0xf] %vm2368_vm14, %v938_v29  ;;  %v845_v26 = vmul.f32 %v1165_v59, %v829_v2  ;;  %v942_v56 = vpack.c.bf16 %v573_v63, %v573_v63  ;;  %899 = vadd.xlane.f32.xlu2 %v898_v57  ;;  %v895_v5 = vsel %vm333_vm0, %v857_v48, 0.0 }
  0xf9   : > { %v547_v7 = vsel %vm2166_vm10, %v1556_v39, %v543_v33  ;;  %v1166_v39 = vld [vmem:[%s1216_s21 + $0x70] sm:$0xff]  ;;  %v819_v41 = vsel %vm2201_vm3, %v2007_v25, %v815_v18  ;;  %vm2369_vm8 = vmmov %vm2344_vm1  ;;  %vm910_vm1 = vcmask 7168  }
  0xfa   : > { %v572_v3 = vmul.f32 %v1166_v39, %v547_v7  ;;  %959 = vst.msk [vmem:[%s1453_s6 + $0x3c] sm:$0xf] %vm2369_vm8, %v942_v56  ;;  %v861_v17 = vmul.f32 %v845_v26, %v573_v63  ;;  %v844_v12 = vmul.f32 %v1167_v1, %v819_v41  ;;  %896 = vadd.xlane.f32.xlu1 %v895_v5 }
  0xfc   : > { %v941_v51 = vpack.c.bf16 %v572_v3, %v572_v3  ;;  %v907_v54 = vsel %vm333_vm0, %v861_v17, 0.0  ;;  %v860_v27 = vmul.f32 %v844_v12, %v572_v3 }
  0xfe   : > { %958 = vst.msk [vmem:[%s1453_s6 + $0x38] sm:$0xf] %vm2370_vm2, %v941_v51  ;;  %v904_v25 = vsel %vm333_vm0, %v860_v27, 0.0 }
 0x100   : > { %908 = vadd.xlane.f32.xlu2 %v907_v54 }
 0x102   : > { %905 = vadd.xlane.f32.xlu1 %v904_v25 }
 0x141   : > { %v864_v47 = vpop.xlane.xlu2 %863 }
 0x142   : > { %911 = vst.msk [vmem:[%s2226_s9] sm:$0xff] %vm910_vm1, %v864_v47 }
 0x143   : > { %v867_v35 = vpop.xlane.xlu0 %866 }
 0x144   : > { %912 = vst.msk [vmem:[%s2226_s9 + $0x8] sm:$0xff] %vm910_vm1, %v867_v35 }
 0x14b   : > { %v873_v60 = vpop.xlane.xlu2 %872 }
 0x14c   : > { %914 = vst.msk [vmem:[%s2226_s9 + $0x18] sm:$0xff] %vm910_vm1, %v873_v60 }
 0x14e   : > { %v876_v24 = vpop.xlane.xlu0 %875 }
 0x14f   : > { %v870_v21 = vpop.xlane.xlu1 %869  ;;  %915 = vst.msk [vmem:[%s2226_s9 + $0x20] sm:$0xff] %vm910_vm1, %v876_v24 }
 0x150   : > { %913 = vst.msk [vmem:[%s2226_s9 + $0x10] sm:$0xff] %vm910_vm1, %v870_v21 }
 0x157   : > { %v885_v61 = vpop.xlane.xlu0 %884 }
 0x158   : > { %918 = vst.msk [vmem:[%s2226_s9 + $0x38] sm:$0xff] %vm910_vm1, %v885_v61 }
 0x159   : > { %v882_v42 = vpop.xlane.xlu2 %881 }
 0x15a   : > { %917 = vst.msk [vmem:[%s2226_s9 + $0x30] sm:$0xff] %vm910_vm1, %v882_v42 }
 0x15d   : > { %v879_v10 = vpop.xlane.xlu1 %878 }
 0x15e   : > { %916 = vst.msk [vmem:[%s2226_s9 + $0x28] sm:$0xff] %vm910_vm1, %v879_v10 }
 0x15f   : > { %v894_v20 = vpop.xlane.xlu0 %893 }
 0x160   : > { %921 = vst.msk [vmem:[%s2226_s9 + $0x50] sm:$0xff] %vm910_vm1, %v894_v20 }
 0x161   : > { %v891_v32 = vpop.xlane.xlu2 %890 }
 0x162   : > { %920 = vst.msk [vmem:[%s2226_s9 + $0x48] sm:$0xff] %vm910_vm1, %v891_v32 }
 0x165   : > { %v888_v16 = vpop.xlane.xlu1 %887 }
 0x166   : > { %919 = vst.msk [vmem:[%s2226_s9 + $0x40] sm:$0xff] %vm910_vm1, %v888_v16 }
 0x16a   : > { %v903_v6 = vpop.xlane.xlu0 %902 }
 0x16b   : > { %v900_v31 = vpop.xlane.xlu2 %899  ;;  %924 = vst.msk [vmem:[%s2226_s9 + $0x68] sm:$0xff] %vm910_vm1, %v903_v6 }
 0x16c   : > { %923 = vst.msk [vmem:[%s2226_s9 + $0x60] sm:$0xff] %vm910_vm1, %v900_v31 }
 0x16d   : > { %v897_v45 = vpop.xlane.xlu1 %896 }
 0x16e   : > { %922 = vst.msk [vmem:[%s2226_s9 + $0x58] sm:$0xff] %vm910_vm1, %v897_v45 }
 0x173   : > { %v909_v11 = vpop.xlane.xlu2 %908 }
 0x174   : > { %926 = vst.msk [vmem:[%s2226_s9 + $0x78] sm:$0xff] %vm910_vm1, %v909_v11 }
 0x175   : > { %v906_v4 = vpop.xlane.xlu1 %905 }
 0x176   : > { %925 = vst.msk [vmem:[%s2226_s9 + $0x70] sm:$0xff] %vm910_vm1, %v906_v4 }
 0x177 PF: > { %s14_s12 = sadd.s32 1, %s1174_s12  }
 0x178   : > { %p11_p7 = scmp.ge.s32.totalorder %s14_s12, 4  }
 0x17a   :  { %13 = sbr.rel (!%p11_p7) target bundleno = 1 (0x1), region = 73 }

</bundles_post_ra>
